<compile_context>
chip_gen: v6e
topology: v6e:2x2x1
jax: 0.10.0
libtpu: 0.0.40
codegen_flags: <defaults>
</compile_context>

<pallas_src>
import functools

import jax
import jax.numpy as jnp
from jax import lax
from jax.experimental import pallas as pl
from jax.experimental.pallas import tpu as pltpu


def _elu(v):
    # ELU(alpha=1): v if v > 0 else exp(v) - 1   (f32 VPU/EUP work)
    return jnp.where(v > 0, v, jnp.exp(v) - 1.0)


def _action_model_kernel(state_ref, rnn_ref, w_ref, b_ref, logits_ref, probs_ref,
                         *, state_dim, rnn_hidden_dim, action_dim):
    f32 = jnp.float32
    cdt = w_ref.dtype            # MXU input dtype (bf16); accumulate in f32
    batch = state_ref.shape[0]
    feat = w_ref.shape[-1]       # lane-padded feature width (multiple of 128)

    # fc1 with the torch.cat fused in: h = state @ W1_s + rnn @ W1_r + b1
    w1s = w_ref[0][:state_dim, :]
    w1r = w_ref[1][:rnn_hidden_dim, :]
    h = (jnp.dot(state_ref[...].astype(cdt), w1s, preferred_element_type=f32)
         + jnp.dot(rnn_ref[...].astype(cdt), w1r, preferred_element_type=f32)
         + b_ref[0:1, :])
    h = _elu(h)

    # fc2 .. fc4 (weights/biases are zero-padded, so padded lanes stay 0)
    for layer in range(1, 4):
        h = _elu(jnp.dot(h.astype(cdt), w_ref[layer + 1],
                         preferred_element_type=f32) + b_ref[layer:layer + 1, :])

    # fc_action -> logits (padded lanes are exactly 0)
    logits = jnp.dot(h.astype(cdt), w_ref[5], preferred_element_type=f32) + b_ref[4:5, :]
    logits_ref[...] = logits

    # softmax over the real action lanes only (mask padded lanes)
    lane = lax.broadcasted_iota(jnp.int32, (batch, feat), 1)
    z = jnp.where(lane < action_dim, logits, jnp.full_like(logits, -1e30))
    m = jnp.max(z, axis=-1, keepdims=True)
    e = jnp.exp(z - m)
    probs_ref[...] = e * pl.reciprocal(jnp.sum(e, axis=-1, keepdims=True), approx=True)


def init_params(key, state_dim, rnn_hidden_dim, action_dim, hidden_dim=100):
    """PyTorch nn.Linear-style init: U(-1/sqrt(fan_in), 1/sqrt(fan_in)).

    Weights are stored (in_features, out_features); biases as (1, out_features).
    """
    dims = [
        (state_dim + rnn_hidden_dim, hidden_dim),  # fc1
        (hidden_dim, hidden_dim),                  # fc2
        (hidden_dim, hidden_dim),                  # fc3
        (hidden_dim, hidden_dim),                  # fc4
        (hidden_dim, action_dim),                  # fc_action
    ]
    params = []
    for (fan_in, fan_out) in dims:
        key, kw, kb = jax.random.split(key, 3)
        bound = 1.0 / jnp.sqrt(fan_in)
        w = jax.random.uniform(kw, (fan_in, fan_out), jnp.float32, -bound, bound)
        b = jax.random.uniform(kb, (1, fan_out), jnp.float32, -bound, bound)
        params.append((w, b))
    return params


def pack_params(params, state_dim, rnn_hidden_dim, *, weight_dtype=jnp.bfloat16):
    """Pack the 5 Linear layers into one padded weight slab + one bias slab."""
    (w1, b1), (w2, b2), (w3, b3), (w4, b4), (wa, ba) = params
    dims = [state_dim, rnn_hidden_dim,
            w2.shape[0], w3.shape[0], w4.shape[0], wa.shape[0],
            w1.shape[1], w2.shape[1], w3.shape[1], w4.shape[1], wa.shape[1]]
    feat = 128 * max(1, -(-max(dims) // 128))   # round up to lane width

    def pad_w(w):
        p = jnp.zeros((feat, feat), jnp.float32)
        return p.at[: w.shape[0], : w.shape[1]].set(w)

    w_list = [w1[:state_dim], w1[state_dim:], w2, w3, w4, wa]
    w_slab = jnp.stack([pad_w(w) for w in w_list]).astype(weight_dtype)

    def pad_b(b):
        p = jnp.zeros((feat,), jnp.float32)
        return p.at[: b.shape[-1]].set(b.reshape(-1))

    b_rows = [pad_b(b) for b in (b1, b2, b3, b4, ba)]
    b_rows += [jnp.zeros((feat,), jnp.float32)] * 3   # pad to 8 sublane rows
    b_slab = jnp.stack(b_rows)                        # (8, feat) f32
    return w_slab, b_slab


@functools.partial(jax.jit, static_argnames=("action_dim",))
def action_model_forward(w_slab, b_slab, state, rnn_hidden, sample_key, *, action_dim):
    """Mirrors ActionModel.forward: returns (action, (logits, probs))."""
    batch, state_dim = state.shape
    rnn_hidden_dim = rnn_hidden.shape[1]
    feat = w_slab.shape[-1]

    kernel = functools.partial(_action_model_kernel,
                               state_dim=state_dim,
                               rnn_hidden_dim=rnn_hidden_dim,
                               action_dim=action_dim)

    vmem = pl.BlockSpec(memory_space=pltpu.MemorySpace.VMEM)
    flops = 2 * batch * feat * (state_dim + rnn_hidden_dim + 4 * feat)
    bytes_accessed = (w_slab.size * jnp.dtype(w_slab.dtype).itemsize
                      + b_slab.size * 4
                      + (state.size + rnn_hidden.size + 2 * batch * feat) * 4)

    logits_pad, probs_pad = pl.pallas_call(
        kernel,
        out_shape=(jax.ShapeDtypeStruct((batch, feat), jnp.float32),
                   jax.ShapeDtypeStruct((batch, feat), jnp.float32)),
        in_specs=[vmem, vmem, vmem, vmem],
        out_specs=(vmem, vmem),
        cost_estimate=pl.CostEstimate(flops=flops,
                                      transcendentals=5 * batch * feat,
                                      bytes_accessed=bytes_accessed),
    )(state.astype(jnp.float32), rnn_hidden.astype(jnp.float32), w_slab, b_slab)

    logits = logits_pad[:, :action_dim]
    probs = probs_pad[:, :action_dim]

    # OneHotCategorical sample + straight-through estimator (plain-JAX glue)
    idx = jax.random.categorical(sample_key, logits, axis=-1)
    one_hot = jax.nn.one_hot(idx, action_dim, dtype=probs.dtype)
    action = one_hot + probs - lax.stop_gradient(probs)
    return action, (logits, probs)


def _reference_forward(params, state, rnn_hidden):
    """Pure-JAX f32 reference of the PyTorch module (for a loose check)."""
    h = jnp.concatenate([state, rnn_hidden], axis=1)
    for i, (w, b) in enumerate(params):
        h = jnp.dot(h, w) + b
        if i < len(params) - 1:
            h = jnp.where(h > 0, h, jnp.exp(h) - 1.0)
    logits = h
    probs = jax.nn.softmax(logits, axis=-1)
    return logits, probs


if __name__ == "__main__":
    # small shapes consistent with the module
    B = 8
    state_dim = 12
    rnn_hidden_dim = 20
    hidden_dim = 32
    action_dim = 8

    key = jax.random.PRNGKey(0)
    k_params, k_state, k_rnn, k_sample = jax.random.split(key, 4)

    params = init_params(k_params, state_dim, rnn_hidden_dim, action_dim, hidden_dim)
    w_slab, b_slab = pack_params(params, state_dim, rnn_hidden_dim)

    state = jax.random.normal(k_state, (B, state_dim), jnp.float32)
    rnn_hidden = jax.random.normal(k_rnn, (B, rnn_hidden_dim), jnp.float32)

    action, (logits, probs) = action_model_forward(
        w_slab, b_slab, state, rnn_hidden, k_sample, action_dim=action_dim)
    jax.block_until_ready((action, logits, probs))

    # sanity checks (loose tolerances: bf16 MXU inputs + approx reciprocal)
    ref_logits, ref_probs = _reference_forward(params, state, rnn_hidden)

    assert action.shape == (B, action_dim)
    assert logits.shape == (B, action_dim)
    assert probs.shape == (B, action_dim)
    assert bool(jnp.all(jnp.isfinite(logits)))
    assert bool(jnp.allclose(jnp.sum(probs, axis=-1), 1.0, atol=1e-2))
    # forward value of straight-through action is exactly one-hot
    assert bool(jnp.allclose(jnp.sum(action, axis=-1), 1.0, atol=1e-5))
    assert bool(jnp.allclose(logits, ref_logits, atol=1e-1, rtol=1e-1))
    assert bool(jnp.allclose(probs, ref_probs, atol=3e-2))

    print("KERNEL_OK")
</pallas_src>

<mosaic_0001>
module attributes {stable_mosaic.version = 11 : i64} {
  func.func @_action_model_kernel(%arg0: memref<8x12xf32, #tpu.memory_space<vmem>>, %arg1: memref<8x20xf32, #tpu.memory_space<vmem>>, %arg2: memref<6x128x128xbf16, #tpu.memory_space<vmem>>, %arg3: memref<8x128xf32, #tpu.memory_space<vmem>>, %arg4: memref<8x128xf32, #tpu.memory_space<vmem>>, %arg5: memref<8x128xf32, #tpu.memory_space<vmem>>) attributes {dimension_semantics = [], scalar_prefetch = 0 : i64, scratch_operands = 0 : i64, tpu.core_type = #tpu.core_type<tc>} {
    %c0 = arith.constant 0 : index
    %c0_0 = arith.constant 0 : index
    %c0_1 = arith.constant 0 : index
    %0 = vector.load %arg2[%c0, %c0_0, %c0_1] : memref<6x128x128xbf16, #tpu.memory_space<vmem>>, vector<1x128x128xbf16>
    %1 = vector.shape_cast %0 : vector<1x128x128xbf16> to vector<128x128xbf16>
    %2 = vector.extract_strided_slice %1 {offsets = [0, 0], sizes = [12, 128], strides = [1, 1]} : vector<128x128xbf16> to vector<12x128xbf16>
    %c1 = arith.constant 1 : index
    %c0_2 = arith.constant 0 : index
    %c0_3 = arith.constant 0 : index
    %3 = vector.load %arg2[%c1, %c0_2, %c0_3] : memref<6x128x128xbf16, #tpu.memory_space<vmem>>, vector<1x128x128xbf16>
    %4 = vector.shape_cast %3 : vector<1x128x128xbf16> to vector<128x128xbf16>
    %5 = vector.extract_strided_slice %4 {offsets = [0, 0], sizes = [20, 128], strides = [1, 1]} : vector<128x128xbf16> to vector<20x128xbf16>
    %c0_4 = arith.constant 0 : index
    %c0_5 = arith.constant 0 : index
    %6 = vector.load %arg0[%c0_4, %c0_5] : memref<8x12xf32, #tpu.memory_space<vmem>>, vector<8x12xf32>
    %7 = arith.truncf %6 : vector<8x12xf32> to vector<8x12xbf16>
    %cst = arith.constant dense<0.000000e+00> : vector<8x128xf32>
    %8 = tpu.matmul %7, %2, %cst {dimension_numbers = #tpu.dot_dimension_numbers<[1], [0], [0], [1], [0, 0, 1, 1], [], []>} : vector<8x12xbf16>, vector<12x128xbf16>, vector<8x128xf32> -> vector<8x128xf32>
    %c0_6 = arith.constant 0 : index
    %c0_7 = arith.constant 0 : index
    %9 = vector.load %arg1[%c0_6, %c0_7] : memref<8x20xf32, #tpu.memory_space<vmem>>, vector<8x20xf32>
    %10 = arith.truncf %9 : vector<8x20xf32> to vector<8x20xbf16>
    %cst_8 = arith.constant dense<0.000000e+00> : vector<8x128xf32>
    %11 = tpu.matmul %10, %5, %cst_8 {dimension_numbers = #tpu.dot_dimension_numbers<[1], [0], [0], [1], [0, 0, 1, 1], [], []>} : vector<8x20xbf16>, vector<20x128xbf16>, vector<8x128xf32> -> vector<8x128xf32>
    %12 = arith.addf %8, %11 : vector<8x128xf32>
    %c0_9 = arith.constant 0 : index
    %c0_10 = arith.constant 0 : index
    %13 = vector.load %arg3[%c0_9, %c0_10] : memref<8x128xf32, #tpu.memory_space<vmem>>, vector<1x128xf32>
    %14 = vector.broadcast %13 : vector<1x128xf32> to vector<8x128xf32>
    %15 = arith.addf %12, %14 : vector<8x128xf32>
    %cst_11 = arith.constant 0.000000e+00 : f32
    %16 = vector.broadcast %cst_11 : f32 to vector<8x128xf32>
    %17 = arith.cmpf ogt, %15, %16 : vector<8x128xf32>
    %18 = math.exp %15 : vector<8x128xf32>
    %cst_12 = arith.constant 1.000000e+00 : f32
    %19 = vector.broadcast %cst_12 : f32 to vector<8x128xf32>
    %20 = arith.subf %18, %19 : vector<8x128xf32>
    %21 = arith.select %17, %15, %20 : vector<8x128xi1>, vector<8x128xf32>
    %22 = arith.truncf %21 : vector<8x128xf32> to vector<8x128xbf16>
    %c2 = arith.constant 2 : index
    %c0_13 = arith.constant 0 : index
    %c0_14 = arith.constant 0 : index
    %23 = vector.load %arg2[%c2, %c0_13, %c0_14] : memref<6x128x128xbf16, #tpu.memory_space<vmem>>, vector<1x128x128xbf16>
    %24 = vector.shape_cast %23 : vector<1x128x128xbf16> to vector<128x128xbf16>
    %cst_15 = arith.constant dense<0.000000e+00> : vector<8x128xf32>
    %25 = tpu.matmul %22, %24, %cst_15 {dimension_numbers = #tpu.dot_dimension_numbers<[1], [0], [0], [1], [0, 0, 1, 1], [], []>} : vector<8x128xbf16>, vector<128x128xbf16>, vector<8x128xf32> -> vector<8x128xf32>
    %c1_16 = arith.constant 1 : index
    %c0_17 = arith.constant 0 : index
    %26 = vector.load %arg3[%c1_16, %c0_17] : memref<8x128xf32, #tpu.memory_space<vmem>>, vector<1x128xf32>
    %27 = vector.broadcast %26 : vector<1x128xf32> to vector<8x128xf32>
    %28 = arith.addf %25, %27 : vector<8x128xf32>
    %cst_18 = arith.constant 0.000000e+00 : f32
    %29 = vector.broadcast %cst_18 : f32 to vector<8x128xf32>
    %30 = arith.cmpf ogt, %28, %29 : vector<8x128xf32>
    %31 = math.exp %28 : vector<8x128xf32>
    %cst_19 = arith.constant 1.000000e+00 : f32
    %32 = vector.broadcast %cst_19 : f32 to vector<8x128xf32>
    %33 = arith.subf %31, %32 : vector<8x128xf32>
    %34 = arith.select %30, %28, %33 : vector<8x128xi1>, vector<8x128xf32>
    %35 = arith.truncf %34 : vector<8x128xf32> to vector<8x128xbf16>
    %c3 = arith.constant 3 : index
    %c0_20 = arith.constant 0 : index
    %c0_21 = arith.constant 0 : index
    %36 = vector.load %arg2[%c3, %c0_20, %c0_21] : memref<6x128x128xbf16, #tpu.memory_space<vmem>>, vector<1x128x128xbf16>
    %37 = vector.shape_cast %36 : vector<1x128x128xbf16> to vector<128x128xbf16>
    %cst_22 = arith.constant dense<0.000000e+00> : vector<8x128xf32>
    %38 = tpu.matmul %35, %37, %cst_22 {dimension_numbers = #tpu.dot_dimension_numbers<[1], [0], [0], [1], [0, 0, 1, 1], [], []>} : vector<8x128xbf16>, vector<128x128xbf16>, vector<8x128xf32> -> vector<8x128xf32>
    %c2_23 = arith.constant 2 : index
    %c0_24 = arith.constant 0 : index
    %39 = vector.load %arg3[%c2_23, %c0_24] : memref<8x128xf32, #tpu.memory_space<vmem>>, vector<1x128xf32>
    %40 = vector.broadcast %39 : vector<1x128xf32> to vector<8x128xf32>
    %41 = arith.addf %38, %40 : vector<8x128xf32>
    %cst_25 = arith.constant 0.000000e+00 : f32
    %42 = vector.broadcast %cst_25 : f32 to vector<8x128xf32>
    %43 = arith.cmpf ogt, %41, %42 : vector<8x128xf32>
    %44 = math.exp %41 : vector<8x128xf32>
    %cst_26 = arith.constant 1.000000e+00 : f32
    %45 = vector.broadcast %cst_26 : f32 to vector<8x128xf32>
    %46 = arith.subf %44, %45 : vector<8x128xf32>
    %47 = arith.select %43, %41, %46 : vector<8x128xi1>, vector<8x128xf32>
    %48 = arith.truncf %47 : vector<8x128xf32> to vector<8x128xbf16>
    %c4 = arith.constant 4 : index
    %c0_27 = arith.constant 0 : index
    %c0_28 = arith.constant 0 : index
    %49 = vector.load %arg2[%c4, %c0_27, %c0_28] : memref<6x128x128xbf16, #tpu.memory_space<vmem>>, vector<1x128x128xbf16>
    %50 = vector.shape_cast %49 : vector<1x128x128xbf16> to vector<128x128xbf16>
    %cst_29 = arith.constant dense<0.000000e+00> : vector<8x128xf32>
    %51 = tpu.matmul %48, %50, %cst_29 {dimension_numbers = #tpu.dot_dimension_numbers<[1], [0], [0], [1], [0, 0, 1, 1], [], []>} : vector<8x128xbf16>, vector<128x128xbf16>, vector<8x128xf32> -> vector<8x128xf32>
    %c3_30 = arith.constant 3 : index
    %c0_31 = arith.constant 0 : index
    %52 = vector.load %arg3[%c3_30, %c0_31] : memref<8x128xf32, #tpu.memory_space<vmem>>, vector<1x128xf32>
    %53 = vector.broadcast %52 : vector<1x128xf32> to vector<8x128xf32>
    %54 = arith.addf %51, %53 : vector<8x128xf32>
    %cst_32 = arith.constant 0.000000e+00 : f32
    %55 = vector.broadcast %cst_32 : f32 to vector<8x128xf32>
    %56 = arith.cmpf ogt, %54, %55 : vector<8x128xf32>
    %57 = math.exp %54 : vector<8x128xf32>
    %cst_33 = arith.constant 1.000000e+00 : f32
    %58 = vector.broadcast %cst_33 : f32 to vector<8x128xf32>
    %59 = arith.subf %57, %58 : vector<8x128xf32>
    %60 = arith.select %56, %54, %59 : vector<8x128xi1>, vector<8x128xf32>
    %61 = arith.truncf %60 : vector<8x128xf32> to vector<8x128xbf16>
    %c5 = arith.constant 5 : index
    %c0_34 = arith.constant 0 : index
    %c0_35 = arith.constant 0 : index
    %62 = vector.load %arg2[%c5, %c0_34, %c0_35] : memref<6x128x128xbf16, #tpu.memory_space<vmem>>, vector<1x128x128xbf16>
    %63 = vector.shape_cast %62 : vector<1x128x128xbf16> to vector<128x128xbf16>
    %cst_36 = arith.constant dense<0.000000e+00> : vector<8x128xf32>
    %64 = tpu.matmul %61, %63, %cst_36 {dimension_numbers = #tpu.dot_dimension_numbers<[1], [0], [0], [1], [0, 0, 1, 1], [], []>} : vector<8x128xbf16>, vector<128x128xbf16>, vector<8x128xf32> -> vector<8x128xf32>
    %c4_37 = arith.constant 4 : index
    %c0_38 = arith.constant 0 : index
    %65 = vector.load %arg3[%c4_37, %c0_38] : memref<8x128xf32, #tpu.memory_space<vmem>>, vector<1x128xf32>
    %66 = vector.broadcast %65 : vector<1x128xf32> to vector<8x128xf32>
    %67 = arith.addf %64, %66 : vector<8x128xf32>
    %c0_39 = arith.constant 0 : index
    %c0_40 = arith.constant 0 : index
    %68 = vector.load %arg4[%c0_39, %c0_40] : memref<8x128xf32, #tpu.memory_space<vmem>>, vector<8x128xf32>
    tpu.vector_store %arg4[%c0_39, %c0_40], %67 {strides = array<i32>} : memref<8x128xf32, #tpu.memory_space<vmem>>, vector<8x128xf32>,
    %69 = tpu.iota {dimensions = array<i32: 1>} : vector<8x128xi32>
    %c8_i32 = arith.constant 8 : i32
    %70 = vector.broadcast %c8_i32 : i32 to vector<8x128xi32>
    %71 = arith.cmpi slt, %69, %70 : vector<8x128xi32>
    %cst_41 = arith.constant -1.000000e+30 : f32
    %72 = vector.broadcast %cst_41 : f32 to vector<8x128xf32>
    %73 = arith.select %71, %67, %72 : vector<8x128xi1>, vector<8x128xf32>
    %cst_42 = arith.constant dense<0xFF800000> : vector<8xf32>
    %74 = vector.multi_reduction <maximumf>, %73, %cst_42 [1] : vector<8x128xf32> to vector<8xf32>
    %75 = vector.shape_cast %74 : vector<8xf32> to vector<8x1xf32>
    %76 = vector.broadcast %75 : vector<8x1xf32> to vector<8x128xf32>
    %77 = arith.subf %73, %76 : vector<8x128xf32>
    %78 = math.exp %77 : vector<8x128xf32>
    %cst_43 = arith.constant dense<0.000000e+00> : vector<8xf32>
    %79 = vector.multi_reduction <add>, %78, %cst_43 [1] : vector<8x128xf32> to vector<8xf32>
    %80 = vector.shape_cast %79 : vector<8xf32> to vector<8x1xf32>
    %81 = tpu.reciprocal %80 {approx = true} : vector<8x1xf32> -> vector<8x1xf32>
    %82 = vector.broadcast %81 : vector<8x1xf32> to vector<8x128xf32>
    %83 = arith.mulf %78, %82 : vector<8x128xf32>
    %c0_44 = arith.constant 0 : index
    %c0_45 = arith.constant 0 : index
    %84 = vector.load %arg5[%c0_44, %c0_45] : memref<8x128xf32, #tpu.memory_space<vmem>>, vector<8x128xf32>
    tpu.vector_store %arg5[%c0_44, %c0_45], %83 {strides = array<i32>} : memref<8x128xf32, #tpu.memory_space<vmem>>, vector<8x128xf32>,
    return
  }
}

</mosaic_0001>

<bundles_post_ra>
// kernel: action_model_forward.1
= control target key start
LH: loop header
LB: loop body
LE: loop exit
PB: predicated region body
PF: predicated region fallthrough
CT: control target
= control target key end

     0   :  { %11 = vsyncpa [#allocation3], 0  ;;  %s903_s18 = smov [#allocation2]   ;;  %s1015_s0 = inlined_call_operand.vmem [shape: f32[8,12], index: 0, kind: input, shape index: {}]   ;;  %s1016_s1 = inlined_call_operand.vmem [shape: f32[8,20], index: 1, kind: input, shape index: {}]   ;;  %s1017_s2 = inlined_call_operand.hbm [shape: bf16[6,128,128], index: 2, kind: input, shape index: {}]   ;;  %s1018_s3 = inlined_call_operand.vmem [shape: f32[8,128], index: 3, kind: input, shape index: {}]   ;;  %s1019_s4 = inlined_call_operand.vmem [shape: f32[8,128], index: 4, kind: output, shape index: {0}]   ;;  %s1020_s5 = inlined_call_operand.vmem [shape: f32[8,128], index: 5, kind: output, shape index: {1}]  }
   0x1   :  { %s21_s19 = sshll.u32 %s903_s18, 4  ;;  %s22_s19 = int_to_ptr.vmem [resolvable:$true] %s21_s19 }
   0x2   :  { %s889_s20 = scalar_lea.vmem %s22_s19, 6144  ;;  %p894_p1 = scmp.lt.s32.totalorder %s22_s19, %s22_s19 }
   0x3   :  { %p890_p0 = scmp.ne.s32.totalorder %s22_s19, %s889_s20  ;;  %p895_p2 = scmp.lt.s32.totalorder %s889_s20, %s889_s20 }
   0x5   :  { %p896_p3 = por %p895_p2, %p894_p1 }
   0x7   :  { %p897_p4 = pnand %p896_p3, %p890_p0 }
   0x9   :  { %900 = shalt.err (!%p897_p4)
}
   0xa   :  { %s904_s21 = smov 64   ;;  %s905_s22 = smov 4  }
   0xb   :  { %27 = dma.hbm_to_vmem [thread:$0]  %s1017_s2, 6144, %s22_s19, [#allocation3], %s904_s21, %s904_s21, %s905_s22  }
   0xc   :  { %901 = dma.done.wait [#allocation3], 6144  }
   0xd   :  { %902 = vsyncadd [#allocation3], 4294961152  ;;  %v906_v0 = vmov 0.0   ;;  %vm907_vm0 = vmmov 0   ;;  %vm57_vm1 = vcmask 1041408   ;;  %vm110_vm2 = vcmask 1045504  }
   0xe   :  { %735 = vmatprep.subr.bf16.mxu0 %v906_v0  ;;  %743 = vmatprep.subr.bf16.mxu1 %v906_v0  ;;  %v834_v1 = vld [vmem:[#allocation2 + $0x48] ss:$0 sps:$4 sm:$0xff]   ;;  %v835_v2 = vld [vmem:[#allocation2] sm:$0xff]   ;;  %vm106_vm3 = vcmask 97280   ;;  %vm53_vm4 = vcmask 162816   ;;  %v837_v9 = vld [vmem:[#allocation2 + $0xb8] sm:$0xff]  }
   0xf   :  { %745 = vmatprep.mubr.msk.bf16.mxu1 %vm907_vm0, %v906_v0  ;;  %739 = vmatprep.mubr.msk.bf16.mxu0 %vm907_vm0, %v906_v0  ;;  %v40_v3 = vld [vmem:[%s1015_s0] sm:$0xff]  ;;  %v59_v4 = vsel %vm57_vm1, %v834_v1, 0  ;;  %v112_v6 = vsel %vm110_vm2, %v835_v2, 0  ;;  %v838_v11 = vld [vmem:[#allocation2 + $0xb0] sm:$0xff]   ;;  %v839_v12 = vld [vmem:[#allocation2 + $0xa8] sm:$0xff]  }
  0x10   :  { %v836_v5 = vld [vmem:[#allocation2 + $0x40] sm:$0xff]   ;;  %736 = vmatpush3.bf16.msra.mxu0 %v59_v4  ;;  %v41_v7 = vpack.c.bf16 %v40_v3, %v40_v3  ;;  %744 = vmatpush3.bf16.msra.mxu1 %v112_v6  ;;  %v841_v14 = vld [vmem:[#allocation2 + $0x98] sm:$0xff]   ;;  %v842_v15 = vld [vmem:[#allocation2 + $0x90] sm:$0xff]  }
  0x11   :  { %v42_v8 = vld [vmem:[%s1016_s1] sm:$0xff]  ;;  %737 = vmatprep.subr.bf16.mxu0 %v906_v0  ;;  %749 = vmatprep.subr.bf16.mxu1 %v906_v0  ;;  %v843_v16 = vld [vmem:[#allocation2 + $0x88] sm:$0xff]   ;;  %v845_v18 = vld [vmem:[#allocation2 + $0xf8] sm:$0xff]  }
  0x12   :  { %v43_v10 = vpack.c.bf16 %v42_v8, %v42_v8  ;;  %v840_v13 = vld [vmem:[#allocation2 + $0xa0] sm:$0xff]   ;;  %v846_v19 = vld [vmem:[#allocation2 + $0xf0] sm:$0xff]   ;;  %v847_v36 = vld [vmem:[#allocation2 + $0xe8] sm:$0xff]  }
  0x13   :  { %746 = vmatmul.mubr.msk.bf16.vlgmr.msra.gmra.mxu1 %vm106_vm3, %v41_v7  ;;  %v844_v17 = vld [vmem:[#allocation2 + $0x80] sm:$0xff]   ;;  %v849_v38 = vld [vmem:[#allocation2 + $0xd8] sm:$0xff]   ;;  %v850_v39 = vld [vmem:[#allocation2 + $0xd0] sm:$0xff]  }
  0x14   :  { %738 = vmatpush3.bf16.msra.mxu0 %v836_v5  ;;  %750 = vmatpush3.bf16.msra.mxu1 %v837_v9  ;;  %v653_v23 = vld [vmem:[%s1018_s3] ss:$0 sm:$0xff]  ;;  %v851_v40 = vld [vmem:[#allocation2 + $0xc8] sm:$0xff]   ;;  %v853_v42 = vld [vmem:[#allocation2 + $0x138] sm:$0xff]  }
  0x15   :  { %765 = vmatprep.mubr.msk.bf16.mxu1 %vm907_vm0, %v906_v0  ;;  %751 = vmatprep.subr.bf16.mxu1 %v906_v0  ;;  %v848_v37 = vld [vmem:[#allocation2 + $0xe0] sm:$0xff]   ;;  %v854_v43 = vld [vmem:[#allocation2 + $0x130] sm:$0xff]   ;;  %v855_v55 = vld [vmem:[#allocation2 + $0x128] sm:$0xff]  }
  0x16   :  { %769 = vmatprep.subr.bf16.mxu0 %v906_v0  ;;  %v852_v41 = vld [vmem:[#allocation2 + $0xc0] sm:$0xff]   ;;  %v857_v57 = vld [vmem:[#allocation2 + $0x118] sm:$0xff]   ;;  %v858_v58 = vld [vmem:[#allocation2 + $0x110] sm:$0xff]  }
  0x17   :  { %740 = vmatmul.mubr.msk.bf16.vlgmr.msra.gmra.mxu0 %vm53_vm4, %v43_v10  ;;  %v655_v44 = vld [vmem:[%s1018_s3 + $0x1] ss:$0 sm:$0xff]  ;;  %v859_v59 = vld [vmem:[#allocation2 + $0x108] sm:$0xff]   ;;  %v861_v61 = vld [vmem:[#allocation2 + $0x178] sm:$0xff]  }
  0x18   :  { %785 = vmatprep.mubr.msk.bf16.mxu0 %vm907_vm0, %v906_v0  ;;  %752 = vmatpush3.bf16.msra.mxu1 %v838_v11  ;;  %v856_v56 = vld [vmem:[#allocation2 + $0x120] sm:$0xff]   ;;  %v862_v62 = vld [vmem:[#allocation2 + $0x170] sm:$0xff]   ;;  %v863_v11 = vld [vmem:[#allocation2 + $0x168] sm:$0xff]  }
  0x19   :  { %753 = vmatprep.subr.bf16.mxu1 %v906_v0  ;;  %770 = vmatpush3.bf16.msra.mxu0 %v845_v18  ;;  %v860_v60 = vld [vmem:[#allocation2 + $0x100] sm:$0xff]  }
  0x1a   :  { %771 = vmatprep.subr.bf16.mxu0 %v906_v0  ;;  %v665_v63 = vld [vmem:[%s1018_s3 + $0x2] ss:$0 sm:$0xff] }
  0x1c   :  { %754 = vmatpush3.bf16.msra.mxu1 %v839_v12  ;;  %v864_v12 = vld [vmem:[#allocation2 + $0x160] sm:$0xff]  }
  0x1d   :  { %755 = vmatprep.subr.bf16.mxu1 %v906_v0  ;;  %772 = vmatpush3.bf16.msra.mxu0 %v846_v19 }
  0x1e   :  { %773 = vmatprep.subr.bf16.mxu0 %v906_v0 }
  0x20   :  { %756 = vmatpush3.bf16.msra.mxu1 %v840_v13  ;;  %v865_v13 = vld [vmem:[#allocation2 + $0x158] sm:$0xff]  }
  0x21   :  { %757 = vmatprep.subr.bf16.mxu1 %v906_v0  ;;  %774 = vmatpush3.bf16.msra.mxu0 %v847_v36 }
  0x22   :  { %775 = vmatprep.subr.bf16.mxu0 %v906_v0 }
  0x24   :  { %758 = vmatpush3.bf16.msra.mxu1 %v841_v14  ;;  %v866_v14 = vld [vmem:[#allocation2 + $0x150] sm:$0xff]  }
  0x25   :  { %759 = vmatprep.subr.bf16.mxu1 %v906_v0  ;;  %776 = vmatpush3.bf16.msra.mxu0 %v848_v37 }
  0x26   :  { %777 = vmatprep.subr.bf16.mxu0 %v906_v0 }
  0x28   :  { %760 = vmatpush3.bf16.msra.mxu1 %v842_v15  ;;  %v867_v15 = vld [vmem:[#allocation2 + $0x148] sm:$0xff]  }
  0x29   :  { %761 = vmatprep.subr.bf16.mxu1 %v906_v0  ;;  %778 = vmatpush3.bf16.msra.mxu0 %v849_v38 }
  0x2a   :  { %779 = vmatprep.subr.bf16.mxu0 %v906_v0 }
  0x2c   :  { %762 = vmatpush3.bf16.msra.mxu1 %v843_v16  ;;  %v868_v16 = vld [vmem:[#allocation2 + $0x140] sm:$0xff]  }
  0x2d   :  { %763 = vmatprep.subr.bf16.mxu1 %v906_v0  ;;  %780 = vmatpush3.bf16.msra.mxu0 %v850_v39 }
  0x2e   :  { %781 = vmatprep.subr.bf16.mxu0 %v906_v0 }
  0x30   :  { %764 = vmatpush3.bf16.msra.mxu1 %v844_v17  ;;  %v675_v17 = vld [vmem:[%s1018_s3 + $0x3] ss:$0 sm:$0xff] }
  0x31   :  { %789 = vmatprep.subr.bf16.mxu1 %v906_v0  ;;  %782 = vmatpush3.bf16.msra.mxu0 %v851_v40 }
  0x32   :  { %783 = vmatprep.subr.bf16.mxu0 %v906_v0 }
  0x35   :  { %784 = vmatpush3.bf16.msra.mxu0 %v852_v41 }
  0x36   :  { %809 = vmatprep.subr.bf16.mxu0 %v906_v0 }
  0xd3   :  { %v148_v20 = vpop.f32.mrf.mxu1 }
  0xd5   :  { %v747_v21 = vpop.f32.mrf.mxu1 }
  0xd7   :  { %v95_v22 = vpop.f32.mrf.mxu0  ;;  %v151_v25 = vpop.f32.mrf.mxu1 }
  0xd8   :  { %v149_v24 = vadd.f32 %v148_v20, %v95_v22 }
  0xd9   :  { %v741_v26 = vpop.f32.mrf.mxu0  ;;  %v748_v28 = vpop.f32.mrf.mxu1 }
  0xda   :  { %v159_v27 = vadd.f32 %v653_v23, %v149_v24 }
  0xdb   :  { %v98_v29 = vpop.f32.mrf.mxu0 }
  0xdc   :  { %v161_v30 = vmul.f32 1.442695, %v159_v27  ;;  %vm160_vm5 = vcmp.gt.f32.partialorder %v159_v27, 0.0  ;;  %v685_v29 = vld [vmem:[%s1018_s3 + $0x4] ss:$0 sm:$0xff] }
  0xdd   :  { %v742_v31 = vpop.f32.mrf.mxu0 }
  0xde   :  { %869 = vpow2.f32 %v161_v30 }
  0xeb   :  { %v870_v32 = vpop.eup %869 }
  0xec   :  { %v654_v33 = vadd.f32 -1.0, %v870_v32 }
  0xee   :  { %v164_v34 = vsel %vm160_vm5, %v159_v27, %v654_v33 }
  0xef   :  { %v165_v35 = vpack.c.bf16 %v164_v34, %v164_v34 }
  0xf1   :  { %766 = vmatmul.mubr.bf16.vlgmr.msra.gmra.mxu1 %v165_v35 }
  0xf2   :  { %805 = vmatprep.mubr.msk.bf16.mxu1 %vm907_vm0, %v906_v0  ;;  %790 = vmatpush3.bf16.msra.mxu1 %v853_v42 }
  0xf3   :  { %791 = vmatprep.subr.bf16.mxu1 %v906_v0 }
  0xf6   :  { %792 = vmatpush3.bf16.msra.mxu1 %v854_v43 }
  0xf7   :  { %793 = vmatprep.subr.bf16.mxu1 %v906_v0 }
  0xfa   :  { %794 = vmatpush3.bf16.msra.mxu1 %v855_v55 }
  0xfb   :  { %795 = vmatprep.subr.bf16.mxu1 %v906_v0 }
  0xfe   :  { %796 = vmatpush3.bf16.msra.mxu1 %v856_v56 }
  0xff   :  { %797 = vmatprep.subr.bf16.mxu1 %v906_v0 }
 0x102   :  { %798 = vmatpush3.bf16.msra.mxu1 %v857_v57 }
 0x103   :  { %799 = vmatprep.subr.bf16.mxu1 %v906_v0 }
 0x106   :  { %800 = vmatpush3.bf16.msra.mxu1 %v858_v58 }
 0x107   :  { %801 = vmatprep.subr.bf16.mxu1 %v906_v0 }
 0x10a   :  { %802 = vmatpush3.bf16.msra.mxu1 %v859_v59 }
 0x10b   :  { %803 = vmatprep.subr.bf16.mxu1 %v906_v0 }
 0x10e   :  { %804 = vmatpush3.bf16.msra.mxu1 %v860_v60 }
 0x1b1   :  { %v270_v45 = vpop.f32.mrf.mxu1 }
 0x1b2   :  { %v271_v46 = vadd.f32 %v655_v44, %v270_v45 }
 0x1b3   :  { %v767_v47 = vpop.f32.mrf.mxu1 }
 0x1b4   :  { %v277_v48 = vmul.f32 1.442695, %v271_v46  ;;  %vm276_vm6 = vcmp.gt.f32.partialorder %v271_v46, 0.0 }
 0x1b5   :  { %v273_v49 = vpop.f32.mrf.mxu1 }
 0x1b6   :  { %871 = vpow2.f32 %v277_v48 }
 0x1b7   :  { %v768_v50 = vpop.f32.mrf.mxu1 }
 0x1c3   :  { %v872_v51 = vpop.eup %871 }
 0x1c4   :  { %v664_v52 = vadd.f32 -1.0, %v872_v51 }
 0x1c6   :  { %v280_v53 = vsel %vm276_vm6, %v271_v46, %v664_v52 }
 0x1c7   :  { %v281_v54 = vpack.c.bf16 %v280_v53, %v280_v53 }
 0x1c9   :  { %786 = vmatmul.mubr.bf16.vlgmr.msra.gmra.mxu0 %v281_v54 }
 0x1ca   :  { %825 = vmatprep.mubr.msk.bf16.mxu0 %vm907_vm0, %v906_v0  ;;  %810 = vmatpush3.bf16.msra.mxu0 %v861_v61 }
 0x1cb   :  { %811 = vmatprep.subr.bf16.mxu0 %v906_v0 }
 0x1ce   :  { %812 = vmatpush3.bf16.msra.mxu0 %v862_v62 }
 0x1cf   :  { %813 = vmatprep.subr.bf16.mxu0 %v906_v0 }
 0x1d2   :  { %814 = vmatpush3.bf16.msra.mxu0 %v863_v11 }
 0x1d3   :  { %815 = vmatprep.subr.bf16.mxu0 %v906_v0 }
 0x1d6   :  { %816 = vmatpush3.bf16.msra.mxu0 %v864_v12 }
 0x1d7   :  { %817 = vmatprep.subr.bf16.mxu0 %v906_v0 }
 0x1da   :  { %818 = vmatpush3.bf16.msra.mxu0 %v865_v13 }
 0x1db   :  { %819 = vmatprep.subr.bf16.mxu0 %v906_v0 }
 0x1de   :  { %820 = vmatpush3.bf16.msra.mxu0 %v866_v14 }
 0x1df   :  { %821 = vmatprep.subr.bf16.mxu0 %v906_v0 }
 0x1e2   :  { %822 = vmatpush3.bf16.msra.mxu0 %v867_v15 }
 0x1e3   :  { %823 = vmatprep.subr.bf16.mxu0 %v906_v0  ;;  %v625_v0 = vlaneseq }
 0x1e5   :  { %v626_v28 = vand.u32 127, %v625_v0 }
 0x1e6   :  { %824 = vmatpush3.bf16.msra.mxu0 %v868_v16 }
 0x1e7   :  { %vm627_vm9 = vcmp.lt.s32.totalorder %v626_v28, 8 }
 0x289   :  { %v386_v1 = vpop.f32.mrf.mxu0 }
 0x28a   :  { %v387_v2 = vadd.f32 %v665_v63, %v386_v1 }
 0x28b   :  { %v787_v3 = vpop.f32.mrf.mxu0 }
 0x28c   :  { %v393_v4 = vmul.f32 1.442695, %v387_v2  ;;  %vm392_vm7 = vcmp.gt.f32.partialorder %v387_v2, 0.0 }
 0x28d   :  { %v389_v5 = vpop.f32.mrf.mxu0 }
 0x28e   :  { %873 = vpow2.f32 %v393_v4 }
 0x28f   :  { %v788_v6 = vpop.f32.mrf.mxu0 }
 0x29b   :  { %v874_v7 = vpop.eup %873 }
 0x29c   :  { %v674_v8 = vadd.f32 -1.0, %v874_v7 }
 0x29e   :  { %v396_v9 = vsel %vm392_vm7, %v387_v2, %v674_v8 }
 0x29f   :  { %v397_v10 = vpack.c.bf16 %v396_v9, %v396_v9 }
 0x2a1   :  { %806 = vmatmul.mubr.bf16.vlgmr.msra.gmra.mxu1 %v397_v10 }
 0x361   :  { %v502_v18 = vpop.f32.mrf.mxu1 }
 0x362   :  { %v503_v19 = vadd.f32 %v675_v17, %v502_v18 }
 0x363   :  { %v807_v20 = vpop.f32.mrf.mxu1 }
 0x364   :  { %v509_v21 = vmul.f32 1.442695, %v503_v19  ;;  %vm508_vm8 = vcmp.gt.f32.partialorder %v503_v19, 0.0 }
 0x365   :  { %v505_v22 = vpop.f32.mrf.mxu1 }
 0x366   :  { %875 = vpow2.f32 %v509_v21 }
 0x367   :  { %v808_v23 = vpop.f32.mrf.mxu1 }
 0x373   :  { %v876_v24 = vpop.eup %875 }
 0x374   :  { %v684_v25 = vadd.f32 -1.0, %v876_v24 }
 0x376   :  { %v512_v26 = vsel %vm508_vm8, %v503_v19, %v684_v25 }
 0x377   :  { %v513_v27 = vpack.c.bf16 %v512_v26, %v512_v26 }
 0x379   :  { %826 = vmatmul.mubr.bf16.vlgmr.msra.gmra.mxu0 %v513_v27 }
 0x439   :  { %v618_v30 = vpop.f32.mrf.mxu0 }
 0x43a   :  { %v619_v31 = vadd.f32 %v685_v29, %v618_v30 }
 0x43b   :  { %v827_v32 = vpop.f32.mrf.mxu0 }
 0x43c   :  { %624 = vst [vmem:[%s1019_s4] sm:$0xff] %v619_v31  ;;  %v628_v33 = vsel %vm627_vm9, %v619_v31, -1e+30 }
 0x43d   :  { %629 = vmax.xlane.f32.xlu0 %v628_v33  ;;  %v621_v34 = vpop.f32.mrf.mxu0 }
 0x43f   :  { %v828_v35 = vpop.f32.mrf.mxu0 }
 0x4c6   :  { %v630_v36 = vpop.xlane.xlu0 %629 }
 0x4c7   :  { %v631_v37 = vsub.f32 %v628_v33, %v630_v36 }
 0x4c9   :  { %v632_v38 = vmul.f32 1.442695, %v631_v37 }
 0x4cb   :  { %877 = vpow2.f32 %v632_v38 }
 0x4d8   :  { %v878_v39 = vpop.eup %877 }
 0x4d9   :  { %634 = vadd.xlane.f32.xlu0 %v878_v39 }
 0x562   :  { %v635_v40 = vpop.xlane.xlu0 %634 }
 0x563   :  { %879 = vrcp.f32 %v635_v40 }
 0x570   :  { %v880_v41 = vpop.eup %879 }
 0x571   :  { %v637_v42 = vmul.f32 %v880_v41, %v878_v39 }
 0x573   :  { %638 = vst [vmem:[%s1020_s5] sm:$0xff] %v637_v42 }
 0x574   :  { %647 = vsyncpa [#allocation3], 1 }

</bundles_post_ra>
